<compile_context>
chip_gen: v5e
topology: v5e:2x2
jax: 0.10.0
libtpu: 0.0.40
codegen_flags: <defaults>
</compile_context>

<pallas_src>
import jax
import jax.numpy as jnp
from jax.experimental import pallas as pl
from jax.experimental.pallas import tpu as pltpu


def _logreg_kernel(x_ref, w_ref, b_ref, o_ref):
    # x_ref: (TB, F) VMEM; w_ref: (8, F) VMEM (row 0 = weight, rows 1-7 zero);
    # b_ref: (1, 1) SMEM; o_ref: (1, TB) VMEM (lane-dense output slab).
    x = x_ref[...].astype(jnp.float32)
    w = w_ref[...].astype(jnp.float32)
    # (8, F) @ (TB, F)^T -> (8, TB) on the MXU; row 0 is x @ W^T, already lane-dense.
    z = jax.lax.dot_general(
        w, x,
        dimension_numbers=(((1,), (1,)), ((), ())),
        preferred_element_type=jnp.float32,
    )
    z0 = z[0:1, :] + b_ref[0, 0]                       # (1, TB) row
    o_ref[...] = jax.nn.sigmoid(z0).astype(o_ref.dtype)


def _vmem_capacity_bytes():
    try:
        cap = getattr(pltpu.get_tpu_info(), "vmem_capacity_bytes", None)
        if cap:
            return int(cap)
    except Exception:
        pass
    return 64 * 1024 * 1024       # conservative fallback (v7x per-core VMEM)


def logistic_regression_forward(x, weight, bias, *, min_grid_steps=8):
    """x: (B, F); weight: (1, F) f32 (nn.Linear layout); bias: (1,) f32 -> (B, 1)."""
    B, F = x.shape
    itemsize = jnp.dtype(x.dtype).itemsize
    out_itemsize = itemsize

    # Tiny batches: pad up to one 128-row tile so block_shape never exceeds the array.
    if B < 128:
        x = jnp.pad(x, ((0, 128 - B), (0, 0)))
    B_run = x.shape[0]

    # ---- per-generation VMEM budget -> batch-tile rows (multiple of 128) ----------
    vmem_cap = _vmem_capacity_bytes()
    vmem_budget = min((3 * vmem_cap) // 4, vmem_cap - 16 * 1024 * 1024)  # ~48 MiB v7x / ~96 MiB v5e,v6e
    f_pad = ((F + 127) // 128) * 128                    # VMEM lane padding of the x tile
    per_row = 2 * (f_pad * itemsize + 8 * out_itemsize)  # double-buffered x tile + (1,TB) out slab
    reserve = 2 * 1024 * 1024                           # weight + compiler scratch slack
    tb_budget = max(128, (vmem_budget - reserve) // per_row)
    # Keep >= ~8 grid steps (4/TensorCore on v7x) when B is large enough.
    tb_grid_cap = max(128, ((pl.cdiv(B_run, min_grid_steps) + 127) // 128) * 128)
    TB = max(128, (min(tb_budget, tb_grid_cap) // 128) * 128)

    grid = pl.cdiv(B_run, TB)

    # Weight as an (8, F) f32 slab (row 0 real, rows 1-7 zero) -> sublane-aligned MXU lhs.
    w8 = jnp.pad(weight.astype(jnp.float32), ((0, 7), (0, 0)))
    b2d = bias.reshape(1, 1).astype(jnp.float32)

    vmem_need = 2 * (TB * f_pad * itemsize + 8 * TB * out_itemsize) + 8 * f_pad * 4
    vmem_limit = int(min(vmem_budget, max(vmem_need + reserve, 32 * 1024 * 1024)))

    out = pl.pallas_call(
        _logreg_kernel,
        out_shape=jax.ShapeDtypeStruct((grid, TB), x.dtype),   # lane-dense output slab
        grid=(grid,),
        in_specs=[
            pl.BlockSpec((TB, F), lambda i: (i, 0)),            # x: streamed batch tiles
            pl.BlockSpec((8, F), lambda i: (0, 0)),             # weight: resident in VMEM
            pl.BlockSpec(memory_space=pltpu.SMEM),              # bias scalar in SMEM
        ],
        out_specs=pl.BlockSpec((1, TB), lambda i: (i, 0)),
        compiler_params=pltpu.CompilerParams(
            dimension_semantics=("parallel",),                  # megacore sharding
            vmem_limit_bytes=vmem_limit,
        ),
    )(x, w8, b2d)

    return out.reshape(grid * TB, 1)[:B]


if __name__ == "__main__":
    key = jax.random.PRNGKey(0)
    kx, kw, kb = jax.random.split(key, 3)

    batch, n_features = 8, 32
    x = jax.random.normal(kx, (batch, n_features), dtype=jnp.float32)

    # Deterministic params matching nn.Linear(n_features, 1):
    bound = 1.0 / jnp.sqrt(jnp.float32(n_features))
    weight = jax.random.uniform(kw, (1, n_features), jnp.float32, -bound, bound)
    bias = jax.random.uniform(kb, (1,), jnp.float32, -bound, bound)

    y = logistic_regression_forward(x, weight, bias)
    y = jax.block_until_ready(y)

    # Reference check against plain JAX
    y_ref = jax.nn.sigmoid(x @ weight.T + bias)
    assert y.shape == (batch, 1)
    assert jnp.allclose(y, y_ref, atol=1e-4), "mismatch vs reference"

    print("KERNEL_OK")
</pallas_src>

<mosaic_0001>
module attributes {stable_mosaic.version = 11 : i64} {
  func.func @_logreg_kernel(%arg0: i32, %arg1: memref<128x32xf32, #tpu.memory_space<vmem>>, %arg2: memref<8x32xf32, #tpu.memory_space<vmem>>, %arg3: memref<1x1xf32, #tpu.memory_space<smem>>, %arg4: memref<1x128xf32, #tpu.memory_space<vmem>>) attributes {dimension_semantics = [#tpu.dimension_semantics<parallel>], iteration_bounds = array<i64: 1>, scalar_prefetch = 0 : i64, scratch_operands = 0 : i64, tpu.core_type = #tpu.core_type<tc>, window_params = [{transform_indices = @transform_0, window_bounds = array<i64: 128, 32>}, {pipeline_mode = #tpu.pipeline_mode<synchronous>, transform_indices = @transform_1, window_bounds = array<i64: 8, 32>}, {transform_indices = @transform_2, window_bounds = array<i64: 1, 1>}, {transform_indices = @transform_3, window_bounds = array<i64: 1, 128>}]} {
    %c0 = arith.constant 0 : index
    %c0_0 = arith.constant 0 : index
    %0 = vector.load %arg1[%c0, %c0_0] : memref<128x32xf32, #tpu.memory_space<vmem>>, vector<128x32xf32>
    %c0_1 = arith.constant 0 : index
    %c0_2 = arith.constant 0 : index
    %1 = vector.load %arg2[%c0_1, %c0_2] : memref<8x32xf32, #tpu.memory_space<vmem>>, vector<8x32xf32>
    %cst = arith.constant dense<0.000000e+00> : vector<8x128xf32>
    %2 = tpu.matmul %1, %0, %cst {dimension_numbers = #tpu.dot_dimension_numbers<[1], [1], [0], [0], [0, 0, 1, 0], [], []>} : vector<8x32xf32>, vector<128x32xf32>, vector<8x128xf32> -> vector<8x128xf32>
    %3 = vector.extract_strided_slice %2 {offsets = [0, 0], sizes = [1, 128], strides = [1, 1]} : vector<8x128xf32> to vector<1x128xf32>
    %c0_3 = arith.constant 0 : index
    %c0_4 = arith.constant 0 : index
    %4 = memref.load %arg3[%c0_3, %c0_4] : memref<1x1xf32, #tpu.memory_space<smem>>
    %5 = vector.broadcast %4 : f32 to vector<1x128xf32>
    %6 = arith.addf %3, %5 : vector<1x128xf32>
    %7 = arith.negf %6 : vector<1x128xf32>
    %8 = math.exp %7 : vector<1x128xf32>
    %cst_5 = arith.constant 1.000000e+00 : f32
    %9 = vector.broadcast %cst_5 : f32 to vector<1x128xf32>
    %10 = arith.addf %9, %8 : vector<1x128xf32>
    %11 = arith.divf %9, %10 : vector<1x128xf32>
    %c0_6 = arith.constant 0 : index
    %c0_7 = arith.constant 0 : index
    %12 = vector.load %arg4[%c0_6, %c0_7] : memref<1x128xf32, #tpu.memory_space<vmem>>, vector<1x128xf32>
    tpu.vector_store %arg4[%c0_6, %c0_7], %11 {strides = array<i32>} : memref<1x128xf32, #tpu.memory_space<vmem>>, vector<1x128xf32>,
    return
  }
  func.func @transform_0(%arg0: i32) -> (i32, i32) {
    %c0_i32 = arith.constant 0 : i32
    %c0_i32_0 = arith.constant 0 : i32
    return %arg0, %c0_i32 : i32, i32
  }
  func.func @transform_1(%arg0: i32) -> (i32, i32) {
    %c0_i32 = arith.constant 0 : i32
    %c0_i32_0 = arith.constant 0 : i32
    %c0_i32_1 = arith.constant 0 : i32
    return %c0_i32, %c0_i32_0 : i32, i32
  }
  func.func @transform_2(%arg0: i32) -> (i32, i32) {
    %c0_i32 = arith.constant 0 : i32
    %c0_i32_0 = arith.constant 0 : i32
    %c0_i32_1 = arith.constant 0 : i32
    return %c0_i32, %c0_i32_0 : i32, i32
  }
  func.func @transform_3(%arg0: i32) -> (i32, i32) {
    %c0_i32 = arith.constant 0 : i32
    %c0_i32_0 = arith.constant 0 : i32
    return %arg0, %c0_i32 : i32, i32
  }
}

</mosaic_0001>

<bundles_post_ra>
// kernel: tpu_custom_call.1
= control target key start
LH: loop header
LB: loop body
LE: loop exit
PB: predicated region body
PF: predicated region fallthrough
CT: control target
= control target key end

     0   :  { %vm33_vm0 = vcmask 261120   ;;  %s288_s0 = inlined_call_operand.vmem [shape: f32[128,32], index: 0, kind: input, shape index: {}]   ;;  %s289_s1 = inlined_call_operand.vmem [shape: f32[8,32], index: 1, kind: input, shape index: {}]   ;;  %s290_s2 = inlined_call_operand.<no memory space> [shape: f32[1,1], index: 2, kind: input, shape index: {}]   ;;  %s291_s3 = inlined_call_operand.hbm [shape: f32[1,128], index: 3, kind: output, shape index: {}]  }
   0x1   :  { %v31_v0 = vld [vmem:[%s288_s0 + $0x78] sm:$0xff]  ;;  %v30_v1 = vld [vmem:[%s288_s0 + $0x70] sm:$0xff] }
   0x2   :  { %144 = vmatpush.xpose.msk.msra.mxu0 %vm33_vm0, %v31_v0 }
   0x3   :  { %9 = vsyncpa [#allocation4], 0  ;;  %v29_v2 = vld [vmem:[%s288_s0 + $0x68] sm:$0xff]  ;;  %v28_v3 = vld [vmem:[%s288_s0 + $0x60] sm:$0xff]  ;;  %v106_v17 = vstv %s290_s2  ;;  %s135_s2 = sshll.u32 %s291_s3, 4  ;;  %s136_s2 = int_to_ptr.hbm [resolvable:$true] %s135_s2 }
   0x4   :  { %v27_v4 = vld [vmem:[%s288_s0 + $0x58] sm:$0xff]  ;;  %v26_v5 = vld [vmem:[%s288_s0 + $0x50] sm:$0xff]  ;;  %v25_v6 = vld [vmem:[%s288_s0 + $0x48] sm:$0xff] }
   0x5   :  { %v24_v7 = vld [vmem:[%s288_s0 + $0x40] sm:$0xff]  ;;  %v23_v8 = vld [vmem:[%s288_s0 + $0x38] sm:$0xff]  ;;  %v22_v9 = vld [vmem:[%s288_s0 + $0x30] sm:$0xff] }
   0x6   :  { %145 = vmatpush.xpose.msk.msra.mxu0 %vm33_vm0, %v30_v1  ;;  %v21_v10 = vld [vmem:[%s288_s0 + $0x28] sm:$0xff]  ;;  %v20_v11 = vld [vmem:[%s288_s0 + $0x20] sm:$0xff]  ;;  %v19_v12 = vld [vmem:[%s288_s0 + $0x18] sm:$0xff] }
   0x7   :  { %v18_v13 = vld [vmem:[%s288_s0 + $0x10] sm:$0xff]  ;;  %v17_v14 = vld [vmem:[%s288_s0 + $0x8] sm:$0xff]  ;;  %v16_v15 = vld [vmem:[%s288_s0] sm:$0xff]  ;;  %s193_s0 = smov [#allocation3]  }
   0x8   :  { %v32_v16 = vld [vmem:[%s289_s1] sm:$0xff]  ;;  %s133_s1 = sshll.u32 %s193_s0, 4  ;;  %s134_s1 = int_to_ptr.vmem [resolvable:$true] %s133_s1 }
   0xa   :  { %146 = vmatpush.xpose.msk.msra.mxu0 %vm33_vm0, %v29_v2 }
   0xe   :  { %147 = vmatpush.xpose.msk.msra.mxu0 %vm33_vm0, %v28_v3 }
  0x12   :  { %148 = vmatpush.xpose.msk.msra.mxu0 %vm33_vm0, %v27_v4 }
  0x16   :  { %149 = vmatpush.xpose.msk.msra.mxu0 %vm33_vm0, %v26_v5 }
  0x1a   :  { %150 = vmatpush.xpose.msk.msra.mxu0 %vm33_vm0, %v25_v6 }
  0x1e   :  { %151 = vmatpush.xpose.msk.msra.mxu0 %vm33_vm0, %v24_v7 }
  0x22   :  { %152 = vmatpush.xpose.msk.msra.mxu0 %vm33_vm0, %v23_v8 }
  0x26   :  { %153 = vmatpush.xpose.msk.msra.mxu0 %vm33_vm0, %v22_v9 }
  0x2a   :  { %154 = vmatpush.xpose.msk.msra.mxu0 %vm33_vm0, %v21_v10 }
  0x2e   :  { %155 = vmatpush.xpose.msk.msra.mxu0 %vm33_vm0, %v20_v11 }
  0x32   :  { %156 = vmatpush.xpose.msk.msra.mxu0 %vm33_vm0, %v19_v12 }
  0x36   :  { %157 = vmatpush.xpose.msk.msra.mxu0 %vm33_vm0, %v18_v13 }
  0x3a   :  { %158 = vmatpush.xpose.msk.msra.mxu0 %vm33_vm0, %v17_v14 }
  0x3e   :  { %159 = vmatpush.xpose.msk.msra.mxu0 %vm33_vm0, %v16_v15 }
  0x41   :  { %160 = vmatmul.msk.f32.vlgmr.msra.gmra.mxu0 %vm33_vm0, %v32_v16 }
  0xbe   :  { %v102_v18 = vpop.f32.mrf.mxu0 }
  0xbf   :  { %v107_v19 = vadd.f32 %v106_v17, %v102_v18 }
  0xc1   :  { %v161_v20 = vmul.f32 -1.442695, %v107_v19 }
  0xc3   :  { %163 = vpow2.f32 %v161_v20 }
  0xc9   :  { %v164_v21 = vpop.eup %163 }
  0xca   :  { %v111_v22 = vadd.f32 1.0, %v164_v21 }
  0xcc   :  { %165 = vrcp.f32 %v111_v22  ;;  %v123_v26 = vand.u32 2147483648, %v111_v22  ;;  %v121_v28 = vand.u32 2147483647, %v111_v22  ;;  %vm117_vm2 = vweird.f32 %v111_v22 }
  0xce   :  { %v124_v30 = vor.u32 1.1754944e-38, %v123_v26  ;;  %vm122_vm4 = vcmp.eq.f32.partialorder %v121_v28, 8.507059e+37 }
  0xd2   :  { %v166_v23 = vpop.eup %165 }
  0xd3   :  { %v113_v24 = vmul.f32 %v166_v23, %v111_v22  ;;  %vm118_vm1 = vweird.f32 %v166_v23 }
  0xd4   :  { %vm119_vm3 = vmor %vm117_vm2, %vm118_vm1 }
  0xd5   :  { %v114_v25 = vsub.f32 1.0, %v113_v24 }
  0xd7   :  { %v115_v27 = vmul.f32 %v166_v23, %v114_v25 }
  0xd9   :  { %v116_v29 = vadd.f32 %v166_v23, %v115_v27 }
  0xdb   :  { %v120_v31 = vsel %vm119_vm3, %v166_v23, %v116_v29 }
  0xdc   :  { %v125_v32 = vsel %vm122_vm4, %v124_v30, %v120_v31 }
  0xdd   :  { %127 = vst [vmem:[#allocation3] sm:$0x1] %v125_v32 }
  0xde   :  { %138 = dma.vmem_to_hbm [thread:$0]  %s134_s1, 16, %s136_s2, [#allocation4]  }
  0xdf   :  { %191 = dma.done.wait [#allocation4], 16  }
  0xe0   :  { %192 = vsyncadd [#allocation4], 4294967280 }
  0xe1   :  { %143 = vsyncpa [#allocation4], 1 }

</bundles_post_ra>
